<compile_context>
chip_gen: v6e
topology: v6e:2x2x1
jax: 0.10.0
libtpu: 0.0.40
codegen_flags: <defaults>
</compile_context>

<pallas_src>
import jax
import jax.numpy as jnp
from jax.experimental import pallas as pl
from jax.experimental.pallas import tpu as pltpu


def _circconv_kernel(x_ref, w_ref, b_ref, o_ref, xcol_ref):
    # x_ref   : (N, C_in, L)      unpadded input, whole array in VMEM
    # w_ref   : (C_out, K*C_in)   flattened weights, w_ref[o, k*C_in + c] = w[o, c, k]
    # b_ref   : (C_out, 1)        bias column
    # o_ref   : (N, C_out, L)     final output layout (no wrapper transpose)
    # xcol_ref: (K*C_in, L)       VMEM scratch: im2col slab for one batch element
    n_batch, c_in, L = x_ref.shape
    c_out, kc = w_ref.shape
    K = kc // c_in
    adj = (K - 1) // 2

    for n in range(n_batch):                      # static unroll; N is small
        xn = x_ref[n]                             # (C_in, L) leading-axis load

        for k in range(K):
            # tap_k[c, l] = x[c, (l + k - adj) mod L] = x[c, (l - s) mod L]
            s = (adj - k) % L
            r0, r1 = k * c_in, (k + 1) * c_in
            if s == 0:
                xcol_ref[r0:r1, :] = xn
            else:
                # Circular shift as two direct scratch stores: no padded
                # intermediate, no lane concat, bounded live ranges.
                # (With L a multiple of 128 this becomes one pltpu.roll per tap.)
                xcol_ref[r0:r1, 0:s] = xn[:, L - s:]
                xcol_ref[r0:r1, s:] = xn[:, :L - s]

        # One fused MXU matmul; bias added on the VPU (free slot while MXU runs).
        acc = jnp.dot(w_ref[...], xcol_ref[...],
                      preferred_element_type=jnp.float32)        # (C_out, L)
        o_ref[n] = (acc + b_ref[...]).astype(o_ref.dtype)


def prepare_circconv_params(weight, bias):
    """One-time layout prep (hoisted out of the per-call path).

    weight: (C_out, C_in, K) -> wmat (C_out, K*C_in) with wmat[o, k*C_in+c] = w[o,c,k]
    bias:   (C_out,)         -> bcol (C_out, 1)
    """
    c_out, c_in, K = weight.shape
    wmat = weight.transpose(0, 2, 1).reshape(c_out, K * c_in)
    bcol = bias.reshape(c_out, 1)
    return wmat, bcol


def circ_conv1d(x, wmat, bcol):
    """x: (N, C_in, L); wmat: (C_out, K*C_in); bcol: (C_out, 1) -> (N, C_out, L)."""
    N, c_in, L = x.shape
    c_out, kc = wmat.shape
    assert kc % c_in == 0
    assert bcol.shape == (c_out, 1)

    return pl.pallas_call(
        _circconv_kernel,
        out_shape=jax.ShapeDtypeStruct((N, c_out, L), x.dtype),
        in_specs=[
            pl.BlockSpec(memory_space=pltpu.MemorySpace.VMEM),   # x  (whole array)
            pl.BlockSpec(memory_space=pltpu.MemorySpace.VMEM),   # wmat
            pl.BlockSpec(memory_space=pltpu.MemorySpace.VMEM),   # bcol
        ],
        out_specs=pl.BlockSpec(memory_space=pltpu.MemorySpace.VMEM),
        scratch_shapes=[pltpu.VMEM((kc, L), x.dtype)],           # im2col slab
    )(x, wmat, bcol)


def _reference(x, weight, bias, adj):
    # Plain-JAX reference of the same circular conv (cross-correlation).
    if adj > 0:
        xpad = jnp.concatenate([x[..., -adj:], x, x[..., :adj]], axis=2)
    else:
        xpad = x
    K = 2 * adj + 1
    L = x.shape[-1]
    patches = jnp.stack([xpad[:, :, k:k + L] for k in range(K)], axis=-1)  # (N,Cin,L,K)
    out = jnp.einsum('nclk,ock->nol', patches, weight)
    return out + bias[None, :, None]


if __name__ == "__main__":
    # Small shapes consistent with the module: batch=2, channels_in=channels_out=4,
    # length=16, adj=4 -> kernel_size=9.
    N, C_IN, C_OUT, L, ADJ = 2, 4, 4, 16, 4
    K = 2 * ADJ + 1

    key = jax.random.PRNGKey(0)
    kx, kw, kb = jax.random.split(key, 3)

    # Deterministic init mimicking nn.Conv1d's uniform(-sqrt(1/(Cin*K)), +sqrt(...)).
    bound = 1.0 / (C_IN * K) ** 0.5
    x = jax.random.normal(kx, (N, C_IN, L), dtype=jnp.float32)
    weight = jax.random.uniform(kw, (C_OUT, C_IN, K), minval=-bound, maxval=bound,
                                dtype=jnp.float32)
    bias = jax.random.uniform(kb, (C_OUT,), minval=-bound, maxval=bound,
                              dtype=jnp.float32)

    # Hoisted, static-with-the-module-params weight/bias layout prep.
    wmat, bcol = prepare_circconv_params(weight, bias)

    circ_conv = jax.jit(circ_conv1d)
    out = circ_conv(x, wmat, bcol)
    out = jax.block_until_ready(out)

    ref = _reference(x, weight, bias, ADJ)
    assert out.shape == (N, C_OUT, L)
    assert jnp.allclose(out, ref, atol=1e-5, rtol=1e-5)

    print("KERNEL_OK")
</pallas_src>

<mosaic_0001>
module attributes {stable_mosaic.version = 11 : i64} {
  func.func @_circconv_kernel(%arg0: memref<2x4x16xf32, #tpu.memory_space<vmem>>, %arg1: memref<4x36xf32, #tpu.memory_space<vmem>>, %arg2: memref<4x1xf32, #tpu.memory_space<vmem>>, %arg3: memref<2x4x16xf32, #tpu.memory_space<vmem>>, %arg4: memref<36x16xf32, #tpu.memory_space<vmem>>) attributes {dimension_semantics = [], scalar_prefetch = 0 : i64, scratch_operands = 1 : i64, tpu.core_type = #tpu.core_type<tc>} {
    %c0 = arith.constant 0 : index
    %c0_0 = arith.constant 0 : index
    %c0_1 = arith.constant 0 : index
    %0 = vector.load %arg0[%c0, %c0_0, %c0_1] : memref<2x4x16xf32, #tpu.memory_space<vmem>>, vector<1x4x16xf32>
    %1 = vector.shape_cast %0 : vector<1x4x16xf32> to vector<4x16xf32>
    %2 = vector.extract_strided_slice %1 {offsets = [0, 12], sizes = [4, 4], strides = [1, 1]} : vector<4x16xf32> to vector<4x4xf32>
    %c0_2 = arith.constant 0 : index
    %c0_3 = arith.constant 0 : index
    %3 = vector.load %arg4[%c0_2, %c0_3] : memref<36x16xf32, #tpu.memory_space<vmem>>, vector<4x4xf32>
    tpu.vector_store %arg4[%c0_2, %c0_3], %2 {strides = array<i32>} : memref<36x16xf32, #tpu.memory_space<vmem>>, vector<4x4xf32>,
    %4 = vector.extract_strided_slice %1 {offsets = [0, 0], sizes = [4, 12], strides = [1, 1]} : vector<4x16xf32> to vector<4x12xf32>
    %c0_4 = arith.constant 0 : index
    %c4 = arith.constant 4 : index
    %5 = vector.load %arg4[%c0_4, %c4] : memref<36x16xf32, #tpu.memory_space<vmem>>, vector<4x12xf32>
    tpu.vector_store %arg4[%c0_4, %c4], %4 {strides = array<i32>} : memref<36x16xf32, #tpu.memory_space<vmem>>, vector<4x12xf32>,
    %6 = vector.extract_strided_slice %1 {offsets = [0, 13], sizes = [4, 3], strides = [1, 1]} : vector<4x16xf32> to vector<4x3xf32>
    %c4_5 = arith.constant 4 : index
    %c0_6 = arith.constant 0 : index
    %7 = vector.load %arg4[%c4_5, %c0_6] : memref<36x16xf32, #tpu.memory_space<vmem>>, vector<4x3xf32>
    tpu.vector_store %arg4[%c4_5, %c0_6], %6 {strides = array<i32>} : memref<36x16xf32, #tpu.memory_space<vmem>>, vector<4x3xf32>,
    %8 = vector.extract_strided_slice %1 {offsets = [0, 0], sizes = [4, 13], strides = [1, 1]} : vector<4x16xf32> to vector<4x13xf32>
    %c4_7 = arith.constant 4 : index
    %c3 = arith.constant 3 : index
    %9 = vector.load %arg4[%c4_7, %c3] : memref<36x16xf32, #tpu.memory_space<vmem>>, vector<4x13xf32>
    tpu.vector_store %arg4[%c4_7, %c3], %8 {strides = array<i32>} : memref<36x16xf32, #tpu.memory_space<vmem>>, vector<4x13xf32>,
    %10 = vector.extract_strided_slice %1 {offsets = [0, 14], sizes = [4, 2], strides = [1, 1]} : vector<4x16xf32> to vector<4x2xf32>
    %c8 = arith.constant 8 : index
    %c0_8 = arith.constant 0 : index
    %11 = vector.load %arg4[%c8, %c0_8] : memref<36x16xf32, #tpu.memory_space<vmem>>, vector<4x2xf32>
    tpu.vector_store %arg4[%c8, %c0_8], %10 {strides = array<i32>} : memref<36x16xf32, #tpu.memory_space<vmem>>, vector<4x2xf32>,
    %12 = vector.extract_strided_slice %1 {offsets = [0, 0], sizes = [4, 14], strides = [1, 1]} : vector<4x16xf32> to vector<4x14xf32>
    %c8_9 = arith.constant 8 : index
    %c2 = arith.constant 2 : index
    %13 = vector.load %arg4[%c8_9, %c2] : memref<36x16xf32, #tpu.memory_space<vmem>>, vector<4x14xf32>
    tpu.vector_store %arg4[%c8_9, %c2], %12 {strides = array<i32>} : memref<36x16xf32, #tpu.memory_space<vmem>>, vector<4x14xf32>,
    %14 = vector.extract_strided_slice %1 {offsets = [0, 15], sizes = [4, 1], strides = [1, 1]} : vector<4x16xf32> to vector<4x1xf32>
    %c12 = arith.constant 12 : index
    %c0_10 = arith.constant 0 : index
    %15 = vector.load %arg4[%c12, %c0_10] : memref<36x16xf32, #tpu.memory_space<vmem>>, vector<4x1xf32>
    tpu.vector_store %arg4[%c12, %c0_10], %14 {strides = array<i32>} : memref<36x16xf32, #tpu.memory_space<vmem>>, vector<4x1xf32>,
    %16 = vector.extract_strided_slice %1 {offsets = [0, 0], sizes = [4, 15], strides = [1, 1]} : vector<4x16xf32> to vector<4x15xf32>
    %c12_11 = arith.constant 12 : index
    %c1 = arith.constant 1 : index
    %17 = vector.load %arg4[%c12_11, %c1] : memref<36x16xf32, #tpu.memory_space<vmem>>, vector<4x15xf32>
    tpu.vector_store %arg4[%c12_11, %c1], %16 {strides = array<i32>} : memref<36x16xf32, #tpu.memory_space<vmem>>, vector<4x15xf32>,
    %c16 = arith.constant 16 : index
    %c0_12 = arith.constant 0 : index
    %18 = vector.load %arg4[%c16, %c0_12] : memref<36x16xf32, #tpu.memory_space<vmem>>, vector<4x16xf32>
    tpu.vector_store %arg4[%c16, %c0_12], %1 {strides = array<i32>} : memref<36x16xf32, #tpu.memory_space<vmem>>, vector<4x16xf32>,
    %19 = vector.extract_strided_slice %1 {offsets = [0, 1], sizes = [4, 15], strides = [1, 1]} : vector<4x16xf32> to vector<4x15xf32>
    %c20 = arith.constant 20 : index
    %c0_13 = arith.constant 0 : index
    %20 = vector.load %arg4[%c20, %c0_13] : memref<36x16xf32, #tpu.memory_space<vmem>>, vector<4x15xf32>
    tpu.vector_store %arg4[%c20, %c0_13], %19 {strides = array<i32>} : memref<36x16xf32, #tpu.memory_space<vmem>>, vector<4x15xf32>,
    %21 = vector.extract_strided_slice %1 {offsets = [0, 0], sizes = [4, 1], strides = [1, 1]} : vector<4x16xf32> to vector<4x1xf32>
    %c20_14 = arith.constant 20 : index
    %c15 = arith.constant 15 : index
    %22 = vector.load %arg4[%c20_14, %c15] : memref<36x16xf32, #tpu.memory_space<vmem>>, vector<4x1xf32>
    tpu.vector_store %arg4[%c20_14, %c15], %21 {strides = array<i32>} : memref<36x16xf32, #tpu.memory_space<vmem>>, vector<4x1xf32>,
    %23 = vector.extract_strided_slice %1 {offsets = [0, 2], sizes = [4, 14], strides = [1, 1]} : vector<4x16xf32> to vector<4x14xf32>
    %c24 = arith.constant 24 : index
    %c0_15 = arith.constant 0 : index
    %24 = vector.load %arg4[%c24, %c0_15] : memref<36x16xf32, #tpu.memory_space<vmem>>, vector<4x14xf32>
    tpu.vector_store %arg4[%c24, %c0_15], %23 {strides = array<i32>} : memref<36x16xf32, #tpu.memory_space<vmem>>, vector<4x14xf32>,
    %25 = vector.extract_strided_slice %1 {offsets = [0, 0], sizes = [4, 2], strides = [1, 1]} : vector<4x16xf32> to vector<4x2xf32>
    %c24_16 = arith.constant 24 : index
    %c14 = arith.constant 14 : index
    %26 = vector.load %arg4[%c24_16, %c14] : memref<36x16xf32, #tpu.memory_space<vmem>>, vector<4x2xf32>
    tpu.vector_store %arg4[%c24_16, %c14], %25 {strides = array<i32>} : memref<36x16xf32, #tpu.memory_space<vmem>>, vector<4x2xf32>,
    %27 = vector.extract_strided_slice %1 {offsets = [0, 3], sizes = [4, 13], strides = [1, 1]} : vector<4x16xf32> to vector<4x13xf32>
    %c28 = arith.constant 28 : index
    %c0_17 = arith.constant 0 : index
    %28 = vector.load %arg4[%c28, %c0_17] : memref<36x16xf32, #tpu.memory_space<vmem>>, vector<4x13xf32>
    tpu.vector_store %arg4[%c28, %c0_17], %27 {strides = array<i32>} : memref<36x16xf32, #tpu.memory_space<vmem>>, vector<4x13xf32>,
    %29 = vector.extract_strided_slice %1 {offsets = [0, 0], sizes = [4, 3], strides = [1, 1]} : vector<4x16xf32> to vector<4x3xf32>
    %c28_18 = arith.constant 28 : index
    %c13 = arith.constant 13 : index
    %30 = vector.load %arg4[%c28_18, %c13] : memref<36x16xf32, #tpu.memory_space<vmem>>, vector<4x3xf32>
    tpu.vector_store %arg4[%c28_18, %c13], %29 {strides = array<i32>} : memref<36x16xf32, #tpu.memory_space<vmem>>, vector<4x3xf32>,
    %31 = vector.extract_strided_slice %1 {offsets = [0, 4], sizes = [4, 12], strides = [1, 1]} : vector<4x16xf32> to vector<4x12xf32>
    %c32 = arith.constant 32 : index
    %c0_19 = arith.constant 0 : index
    %32 = vector.load %arg4[%c32, %c0_19] : memref<36x16xf32, #tpu.memory_space<vmem>>, vector<4x12xf32>
    tpu.vector_store %arg4[%c32, %c0_19], %31 {strides = array<i32>} : memref<36x16xf32, #tpu.memory_space<vmem>>, vector<4x12xf32>,
    %33 = vector.extract_strided_slice %1 {offsets = [0, 0], sizes = [4, 4], strides = [1, 1]} : vector<4x16xf32> to vector<4x4xf32>
    %c32_20 = arith.constant 32 : index
    %c12_21 = arith.constant 12 : index
    %34 = vector.load %arg4[%c32_20, %c12_21] : memref<36x16xf32, #tpu.memory_space<vmem>>, vector<4x4xf32>
    tpu.vector_store %arg4[%c32_20, %c12_21], %33 {strides = array<i32>} : memref<36x16xf32, #tpu.memory_space<vmem>>, vector<4x4xf32>,
    %c0_22 = arith.constant 0 : index
    %c0_23 = arith.constant 0 : index
    %35 = vector.load %arg1[%c0_22, %c0_23] : memref<4x36xf32, #tpu.memory_space<vmem>>, vector<4x36xf32>
    %c0_24 = arith.constant 0 : index
    %c0_25 = arith.constant 0 : index
    %36 = vector.load %arg4[%c0_24, %c0_25] : memref<36x16xf32, #tpu.memory_space<vmem>>, vector<36x16xf32>
    %cst = arith.constant dense<0.000000e+00> : vector<4x16xf32>
    %37 = tpu.matmul %35, %36, %cst {dimension_numbers = #tpu.dot_dimension_numbers<[1], [0], [0], [1], [0, 0, 1, 1], [], []>} : vector<4x36xf32>, vector<36x16xf32>, vector<4x16xf32> -> vector<4x16xf32>
    %c0_26 = arith.constant 0 : index
    %c0_27 = arith.constant 0 : index
    %38 = vector.load %arg2[%c0_26, %c0_27] : memref<4x1xf32, #tpu.memory_space<vmem>>, vector<4x1xf32>
    %39 = vector.broadcast %38 : vector<4x1xf32> to vector<4x16xf32>
    %40 = arith.addf %37, %39 : vector<4x16xf32>
    %c0_28 = arith.constant 0 : index
    %c0_29 = arith.constant 0 : index
    %c0_30 = arith.constant 0 : index
    %41 = vector.load %arg3[%c0_28, %c0_29, %c0_30] : memref<2x4x16xf32, #tpu.memory_space<vmem>>, vector<1x4x16xf32>
    %42 = vector.shape_cast %41 : vector<1x4x16xf32> to vector<4x16xf32>
    %43 = vector.shape_cast %40 : vector<4x16xf32> to vector<1x4x16xf32>
    tpu.vector_store %arg3[%c0_28, %c0_29, %c0_30], %43 {strides = array<i32>} : memref<2x4x16xf32, #tpu.memory_space<vmem>>, vector<1x4x16xf32>,
    %c1_31 = arith.constant 1 : index
    %c0_32 = arith.constant 0 : index
    %c0_33 = arith.constant 0 : index
    %44 = vector.load %arg0[%c1_31, %c0_32, %c0_33] : memref<2x4x16xf32, #tpu.memory_space<vmem>>, vector<1x4x16xf32>
    %45 = vector.shape_cast %44 : vector<1x4x16xf32> to vector<4x16xf32>
    %46 = vector.extract_strided_slice %45 {offsets = [0, 12], sizes = [4, 4], strides = [1, 1]} : vector<4x16xf32> to vector<4x4xf32>
    %c0_34 = arith.constant 0 : index
    %c0_35 = arith.constant 0 : index
    %47 = vector.load %arg4[%c0_34, %c0_35] : memref<36x16xf32, #tpu.memory_space<vmem>>, vector<4x4xf32>
    tpu.vector_store %arg4[%c0_34, %c0_35], %46 {strides = array<i32>} : memref<36x16xf32, #tpu.memory_space<vmem>>, vector<4x4xf32>,
    %48 = vector.extract_strided_slice %45 {offsets = [0, 0], sizes = [4, 12], strides = [1, 1]} : vector<4x16xf32> to vector<4x12xf32>
    %c0_36 = arith.constant 0 : index
    %c4_37 = arith.constant 4 : index
    %49 = vector.load %arg4[%c0_36, %c4_37] : memref<36x16xf32, #tpu.memory_space<vmem>>, vector<4x12xf32>
    tpu.vector_store %arg4[%c0_36, %c4_37], %48 {strides = array<i32>} : memref<36x16xf32, #tpu.memory_space<vmem>>, vector<4x12xf32>,
    %50 = vector.extract_strided_slice %45 {offsets = [0, 13], sizes = [4, 3], strides = [1, 1]} : vector<4x16xf32> to vector<4x3xf32>
    %c4_38 = arith.constant 4 : index
    %c0_39 = arith.constant 0 : index
    %51 = vector.load %arg4[%c4_38, %c0_39] : memref<36x16xf32, #tpu.memory_space<vmem>>, vector<4x3xf32>
    tpu.vector_store %arg4[%c4_38, %c0_39], %50 {strides = array<i32>} : memref<36x16xf32, #tpu.memory_space<vmem>>, vector<4x3xf32>,
    %52 = vector.extract_strided_slice %45 {offsets = [0, 0], sizes = [4, 13], strides = [1, 1]} : vector<4x16xf32> to vector<4x13xf32>
    %c4_40 = arith.constant 4 : index
    %c3_41 = arith.constant 3 : index
    %53 = vector.load %arg4[%c4_40, %c3_41] : memref<36x16xf32, #tpu.memory_space<vmem>>, vector<4x13xf32>
    tpu.vector_store %arg4[%c4_40, %c3_41], %52 {strides = array<i32>} : memref<36x16xf32, #tpu.memory_space<vmem>>, vector<4x13xf32>,
    %54 = vector.extract_strided_slice %45 {offsets = [0, 14], sizes = [4, 2], strides = [1, 1]} : vector<4x16xf32> to vector<4x2xf32>
    %c8_42 = arith.constant 8 : index
    %c0_43 = arith.constant 0 : index
    %55 = vector.load %arg4[%c8_42, %c0_43] : memref<36x16xf32, #tpu.memory_space<vmem>>, vector<4x2xf32>
    tpu.vector_store %arg4[%c8_42, %c0_43], %54 {strides = array<i32>} : memref<36x16xf32, #tpu.memory_space<vmem>>, vector<4x2xf32>,
    %56 = vector.extract_strided_slice %45 {offsets = [0, 0], sizes = [4, 14], strides = [1, 1]} : vector<4x16xf32> to vector<4x14xf32>
    %c8_44 = arith.constant 8 : index
    %c2_45 = arith.constant 2 : index
    %57 = vector.load %arg4[%c8_44, %c2_45] : memref<36x16xf32, #tpu.memory_space<vmem>>, vector<4x14xf32>
    tpu.vector_store %arg4[%c8_44, %c2_45], %56 {strides = array<i32>} : memref<36x16xf32, #tpu.memory_space<vmem>>, vector<4x14xf32>,
    %58 = vector.extract_strided_slice %45 {offsets = [0, 15], sizes = [4, 1], strides = [1, 1]} : vector<4x16xf32> to vector<4x1xf32>
    %c12_46 = arith.constant 12 : index
    %c0_47 = arith.constant 0 : index
    %59 = vector.load %arg4[%c12_46, %c0_47] : memref<36x16xf32, #tpu.memory_space<vmem>>, vector<4x1xf32>
    tpu.vector_store %arg4[%c12_46, %c0_47], %58 {strides = array<i32>} : memref<36x16xf32, #tpu.memory_space<vmem>>, vector<4x1xf32>,
    %60 = vector.extract_strided_slice %45 {offsets = [0, 0], sizes = [4, 15], strides = [1, 1]} : vector<4x16xf32> to vector<4x15xf32>
    %c12_48 = arith.constant 12 : index
    %c1_49 = arith.constant 1 : index
    %61 = vector.load %arg4[%c12_48, %c1_49] : memref<36x16xf32, #tpu.memory_space<vmem>>, vector<4x15xf32>
    tpu.vector_store %arg4[%c12_48, %c1_49], %60 {strides = array<i32>} : memref<36x16xf32, #tpu.memory_space<vmem>>, vector<4x15xf32>,
    %c16_50 = arith.constant 16 : index
    %c0_51 = arith.constant 0 : index
    %62 = vector.load %arg4[%c16_50, %c0_51] : memref<36x16xf32, #tpu.memory_space<vmem>>, vector<4x16xf32>
    tpu.vector_store %arg4[%c16_50, %c0_51], %45 {strides = array<i32>} : memref<36x16xf32, #tpu.memory_space<vmem>>, vector<4x16xf32>,
    %63 = vector.extract_strided_slice %45 {offsets = [0, 1], sizes = [4, 15], strides = [1, 1]} : vector<4x16xf32> to vector<4x15xf32>
    %c20_52 = arith.constant 20 : index
    %c0_53 = arith.constant 0 : index
    %64 = vector.load %arg4[%c20_52, %c0_53] : memref<36x16xf32, #tpu.memory_space<vmem>>, vector<4x15xf32>
    tpu.vector_store %arg4[%c20_52, %c0_53], %63 {strides = array<i32>} : memref<36x16xf32, #tpu.memory_space<vmem>>, vector<4x15xf32>,
    %65 = vector.extract_strided_slice %45 {offsets = [0, 0], sizes = [4, 1], strides = [1, 1]} : vector<4x16xf32> to vector<4x1xf32>
    %c20_54 = arith.constant 20 : index
    %c15_55 = arith.constant 15 : index
    %66 = vector.load %arg4[%c20_54, %c15_55] : memref<36x16xf32, #tpu.memory_space<vmem>>, vector<4x1xf32>
    tpu.vector_store %arg4[%c20_54, %c15_55], %65 {strides = array<i32>} : memref<36x16xf32, #tpu.memory_space<vmem>>, vector<4x1xf32>,
    %67 = vector.extract_strided_slice %45 {offsets = [0, 2], sizes = [4, 14], strides = [1, 1]} : vector<4x16xf32> to vector<4x14xf32>
    %c24_56 = arith.constant 24 : index
    %c0_57 = arith.constant 0 : index
    %68 = vector.load %arg4[%c24_56, %c0_57] : memref<36x16xf32, #tpu.memory_space<vmem>>, vector<4x14xf32>
    tpu.vector_store %arg4[%c24_56, %c0_57], %67 {strides = array<i32>} : memref<36x16xf32, #tpu.memory_space<vmem>>, vector<4x14xf32>,
    %69 = vector.extract_strided_slice %45 {offsets = [0, 0], sizes = [4, 2], strides = [1, 1]} : vector<4x16xf32> to vector<4x2xf32>
    %c24_58 = arith.constant 24 : index
    %c14_59 = arith.constant 14 : index
    %70 = vector.load %arg4[%c24_58, %c14_59] : memref<36x16xf32, #tpu.memory_space<vmem>>, vector<4x2xf32>
    tpu.vector_store %arg4[%c24_58, %c14_59], %69 {strides = array<i32>} : memref<36x16xf32, #tpu.memory_space<vmem>>, vector<4x2xf32>,
    %71 = vector.extract_strided_slice %45 {offsets = [0, 3], sizes = [4, 13], strides = [1, 1]} : vector<4x16xf32> to vector<4x13xf32>
    %c28_60 = arith.constant 28 : index
    %c0_61 = arith.constant 0 : index
    %72 = vector.load %arg4[%c28_60, %c0_61] : memref<36x16xf32, #tpu.memory_space<vmem>>, vector<4x13xf32>
    tpu.vector_store %arg4[%c28_60, %c0_61], %71 {strides = array<i32>} : memref<36x16xf32, #tpu.memory_space<vmem>>, vector<4x13xf32>,
    %73 = vector.extract_strided_slice %45 {offsets = [0, 0], sizes = [4, 3], strides = [1, 1]} : vector<4x16xf32> to vector<4x3xf32>
    %c28_62 = arith.constant 28 : index
    %c13_63 = arith.constant 13 : index
    %74 = vector.load %arg4[%c28_62, %c13_63] : memref<36x16xf32, #tpu.memory_space<vmem>>, vector<4x3xf32>
    tpu.vector_store %arg4[%c28_62, %c13_63], %73 {strides = array<i32>} : memref<36x16xf32, #tpu.memory_space<vmem>>, vector<4x3xf32>,
    %75 = vector.extract_strided_slice %45 {offsets = [0, 4], sizes = [4, 12], strides = [1, 1]} : vector<4x16xf32> to vector<4x12xf32>
    %c32_64 = arith.constant 32 : index
    %c0_65 = arith.constant 0 : index
    %76 = vector.load %arg4[%c32_64, %c0_65] : memref<36x16xf32, #tpu.memory_space<vmem>>, vector<4x12xf32>
    tpu.vector_store %arg4[%c32_64, %c0_65], %75 {strides = array<i32>} : memref<36x16xf32, #tpu.memory_space<vmem>>, vector<4x12xf32>,
    %77 = vector.extract_strided_slice %45 {offsets = [0, 0], sizes = [4, 4], strides = [1, 1]} : vector<4x16xf32> to vector<4x4xf32>
    %c32_66 = arith.constant 32 : index
    %c12_67 = arith.constant 12 : index
    %78 = vector.load %arg4[%c32_66, %c12_67] : memref<36x16xf32, #tpu.memory_space<vmem>>, vector<4x4xf32>
    tpu.vector_store %arg4[%c32_66, %c12_67], %77 {strides = array<i32>} : memref<36x16xf32, #tpu.memory_space<vmem>>, vector<4x4xf32>,
    %c0_68 = arith.constant 0 : index
    %c0_69 = arith.constant 0 : index
    %79 = vector.load %arg1[%c0_68, %c0_69] : memref<4x36xf32, #tpu.memory_space<vmem>>, vector<4x36xf32>
    %c0_70 = arith.constant 0 : index
    %c0_71 = arith.constant 0 : index
    %80 = vector.load %arg4[%c0_70, %c0_71] : memref<36x16xf32, #tpu.memory_space<vmem>>, vector<36x16xf32>
    %cst_72 = arith.constant dense<0.000000e+00> : vector<4x16xf32>
    %81 = tpu.matmul %79, %80, %cst_72 {dimension_numbers = #tpu.dot_dimension_numbers<[1], [0], [0], [1], [0, 0, 1, 1], [], []>} : vector<4x36xf32>, vector<36x16xf32>, vector<4x16xf32> -> vector<4x16xf32>
    %c0_73 = arith.constant 0 : index
    %c0_74 = arith.constant 0 : index
    %82 = vector.load %arg2[%c0_73, %c0_74] : memref<4x1xf32, #tpu.memory_space<vmem>>, vector<4x1xf32>
    %83 = vector.broadcast %82 : vector<4x1xf32> to vector<4x16xf32>
    %84 = arith.addf %81, %83 : vector<4x16xf32>
    %c1_75 = arith.constant 1 : index
    %c0_76 = arith.constant 0 : index
    %c0_77 = arith.constant 0 : index
    %85 = vector.load %arg3[%c1_75, %c0_76, %c0_77] : memref<2x4x16xf32, #tpu.memory_space<vmem>>, vector<1x4x16xf32>
    %86 = vector.shape_cast %85 : vector<1x4x16xf32> to vector<4x16xf32>
    %87 = vector.shape_cast %84 : vector<4x16xf32> to vector<1x4x16xf32>
    tpu.vector_store %arg3[%c1_75, %c0_76, %c0_77], %87 {strides = array<i32>} : memref<2x4x16xf32, #tpu.memory_space<vmem>>, vector<1x4x16xf32>,
    return
  }
}

</mosaic_0001>

<bundles_post_ra>
// kernel: circ_conv1d.1
= control target key start
LH: loop header
LB: loop body
LE: loop exit
PB: predicated region body
PF: predicated region fallthrough
CT: control target
= control target key end

     0   :  { %8 = vsyncpa [#allocation4], 0  ;;  %s634_s0 = inlined_call_operand.hbm [shape: f32[2,4,16], index: 0, kind: input, shape index: {}]   ;;  %s635_s1 = inlined_call_operand.vmem [shape: f32[4,36], index: 1, kind: input, shape index: {}]   ;;  %s636_s2 = inlined_call_operand.vmem [shape: f32[4,1], index: 2, kind: input, shape index: {}]   ;;  %s637_s3 = inlined_call_operand.hbm [shape: f32[2,4,16], index: 3, kind: output, shape index: {}]  }
   0x1   :  { %9 = vsyncpa [#allocation5], 0  ;;  %s489_s12 = smov [#allocation3]  }
   0x2   :  { %s15_s13 = sshll.u32 %s489_s12, 4  ;;  %s16_s13 = int_to_ptr.vmem [resolvable:$true] %s15_s13 }
   0x3   :  { %s453_s14 = scalar_lea.vmem %s16_s13, 128  ;;  %p458_p1 = scmp.lt.s32.totalorder %s16_s13, %s16_s13 }
   0x4   :  { %p454_p0 = scmp.ne.s32.totalorder %s16_s13, %s453_s14  ;;  %p459_p2 = scmp.lt.s32.totalorder %s453_s14, %s453_s14 }
   0x6   :  { %p460_p3 = por %p459_p2, %p458_p1 }
   0x8   :  { %p461_p4 = pnand %p460_p3, %p454_p0 }
   0xa   :  { %464 = shalt.err (!%p461_p4)
}
   0xb   :  { %s490_s15 = smov 64   ;;  %s491_s16 = smov 4  }
   0xc   :  { %21 = dma.hbm_to_vmem [thread:$0]  %s634_s0, 128, %s16_s13, [#allocation4], %s490_s15, %s490_s15, %s491_s16  }
   0xd   :  { %485 = dma.done.wait [#allocation4], 128  }
   0xe   :  { %486 = vsyncadd [#allocation4], 4294967168  ;;  %v492_v0 = vmov 0.0   ;;  %v29_v1 = vld [vmem:[#allocation3] sm:$0xf]  ;;  %vm640_vm0 = vcmask 125952  }
   0xf   :  { %395 = vmatprep.subr.mxu0 %v492_v0  ;;  %408 = vmatprep.subr.mxu1 %v492_v0  ;;  %s493_s19 = smov 126   ;;  %s494_s20 = smov 124   ;;  %72 = vst.msk [vmem:[#allocation2 + $0x10] sm:$0xf] %vm640_vm0, %v29_v1  ;;  %v544_v2 = vld [vmem:[#allocation3 + $0x4] sm:$0xf] }
  0x10   :  { %83 = vrot.lane.b32.xlu1 %v29_v1, %s493_s19  ;;  %103 = vrot.lane.b32.xlu0 %v29_v1, %s494_s20  ;;  %s495_s21 = smov 125   ;;  %s496_s0 = smov 12   ;;  %vm508_vm1 = vmmov 0   ;;  %v509_v3 = vmov 0   ;;  %v278_v4 = vld [vmem:[%s636_s2] sm:$0xf] }
  0x11   :  { %s497_s22 = smov 13   ;;  %s498_s23 = smov 14   ;;  %405 = vmatprep.mubr.msk.f32.mxu0 %vm508_vm1, %v492_v0  ;;  %418 = vmatprep.mubr.msk.f32.mxu1 %vm508_vm1, %v492_v0  ;;  %v119_v5 = vld [vmem:[%s636_s2] sm:$0xf]  ;;  %vm86_vm2 = vcmask 109568   ;;  %vm106_vm3 = vcmask 93184  }
  0x12   :  { %s499_s24 = smov 15   ;;  %s500_s25 = smov 127   ;;  %444 = vset.pattern.permute.xlu1 %v509_v3  ;;  %443 = vset.pattern.permute.xlu0 %v509_v3  ;;  %vm96_vm4 = vcmask 101376   ;;  %vm111_vm5 = vcmask 126048   ;;  %vm101_vm6 = vcmask 126056   ;;  %vm91_vm7 = vcmask 126064  }
  0x13   :  { %s501_s26 = smov 113   ;;  %s502_s27 = smov 114   ;;  %vm76_vm8 = vcmask 117760   ;;  %vm129_vm9 = vcmask 1043456   ;;  %vm81_vm10 = vcmask 126072   ;;  %vm639_vm11 = vcmask 3072  }
  0x14   :  { %93 = vrot.lane.b32.xlu1 %v29_v1, %s495_s21  ;;  %108 = vrot.lane.b32.xlu0 %v29_v1, %s496_s0  ;;  %s503_s28 = smov 1   ;;  %s504_s29 = smov 2   ;;  %vm638_vm12 = vcmask 11264   ;;  %vm69_vm13 = vcmask 125960   ;;  %vm59_vm14 = vcmask 125968   ;;  %vm44_vm15 = vcmask 19456  }
  0x15   :  { %s505_s30 = smov 115   ;;  %s506_s4 = smov 116   ;;  %vm34_vm1 = vcmask 27648   ;;  %v113_v28 = vld [vmem:[%s635_s1] sm:$0xf] }
  0x16   :  { %s507_s5 = smov 3   ;;  %v272_v48 = vld [vmem:[%s635_s1] sm:$0xf]  ;;  %s510_s13 = smov [#allocation6]  }
  0x17   :  { %s367_s14 = sshll.u32 %s510_s13, 4  ;;  %s368_s14 = int_to_ptr.vmem [resolvable:$true] %s367_s14 }
  0x18   :  { %98 = vrot.lane.b32.xlu1 %v29_v1, %s497_s22  ;;  %88 = vrot.lane.b32.xlu0 %v29_v1, %s498_s23  ;;  %s465_s1 = scalar_lea.vmem %s368_s14, 128  ;;  %p470_p6 = scmp.lt.s32.totalorder %s368_s14, %s368_s14 }
  0x19   :  { %p466_p5 = scmp.ne.s32.totalorder %s368_s14, %s465_s1  ;;  %p471_p7 = scmp.lt.s32.totalorder %s465_s1, %s465_s1 }
  0x1b   :  { %p472_p8 = por %p471_p7, %p470_p6 }
  0x1c   :  { %78 = vrot.lane.b32.xlu1 %v29_v1, %s499_s24  ;;  %73 = vrot.lane.b32.xlu0 %v29_v1, %s500_s25 }
  0x1d   :  { %p473_p9 = pnand %p472_p8, %p466_p5 }
  0x20   :  { %61 = vrot.lane.b32.xlu1 %v29_v1, %s501_s26  ;;  %51 = vrot.lane.b32.xlu0 %v29_v1, %s502_s27 }
  0x24   :  { %66 = vrot.lane.b32.xlu1 %v29_v1, %s503_s28  ;;  %56 = vrot.lane.b32.xlu0 %v29_v1, %s504_s29 }
  0x28   :  { %41 = vrot.lane.b32.xlu1 %v29_v1, %s505_s30  ;;  %31 = vrot.lane.b32.xlu0 %v29_v1, %s506_s4 }
  0x2c   :  { %46 = vrot.lane.b32.xlu1 %v29_v1, %s507_s5  ;;  %36 = vrot.lane.b32.xlu0 %v29_v1, %s491_s16 }
  0x30   :  { %268 = vrot.lane.b32.xlu1 %v544_v2, %s496_s0  ;;  %264 = vrot.lane.b32.xlu0 %v544_v2, %s494_s20 }
  0x34   :  { %256 = vrot.lane.b32.xlu1 %v544_v2, %s495_s21  ;;  %248 = vrot.lane.b32.xlu0 %v544_v2, %s493_s19 }
  0x38   :  { %260 = vrot.lane.b32.xlu1 %v544_v2, %s497_s22  ;;  %252 = vrot.lane.b32.xlu0 %v544_v2, %s498_s23 }
  0x3c   :  { %244 = vrot.lane.b32.xlu1 %v544_v2, %s499_s24  ;;  %240 = vrot.lane.b32.xlu0 %v544_v2, %s500_s25 }
  0x40   :  { %231 = vrot.lane.b32.xlu1 %v544_v2, %s501_s26  ;;  %223 = vrot.lane.b32.xlu0 %v544_v2, %s502_s27 }
  0x44   :  { %235 = vrot.lane.b32.xlu1 %v544_v2, %s503_s28  ;;  %227 = vrot.lane.b32.xlu0 %v544_v2, %s504_s29 }
  0x48   :  { %215 = vrot.lane.b32.xlu1 %v544_v2, %s505_s30  ;;  %207 = vrot.lane.b32.xlu0 %v544_v2, %s506_s4 }
  0x4c   :  { %219 = vrot.lane.b32.xlu1 %v544_v2, %s507_s5  ;;  %211 = vrot.lane.b32.xlu0 %v544_v2, %s491_s16 }
  0x50   :  { %281 = vperm.xlu1 %444, %v278_v4   ;;  %122 = vperm.xlu0 %443, %v119_v5  }
  0x82   :  { %v84_v6 = vpop.permute.xlu1 %83  ;;  %v104_v7 = vpop.permute.xlu0 %103 }
  0x83   :  { %87 = vst.msk [vmem:[#allocation2 + $0x18] sm:$0xf] %vm86_vm2, %v84_v6 }
  0x84   :  { %107 = vst.msk [vmem:[#allocation2 + $0x20] sm:$0xf] %vm106_vm3, %v104_v7 }
  0x86   :  { %v94_v8 = vpop.permute.xlu1 %93  ;;  %v109_v9 = vpop.permute.xlu0 %108 }
  0x87   :  { %97 = vst.msk [vmem:[#allocation2 + $0x1c] sm:$0xf] %vm96_vm4, %v94_v8 }
  0x88   :  { %112 = vst.msk [vmem:[#allocation2 + $0x20] sm:$0xf] %vm111_vm5, %v109_v9 }
  0x8a   :  { %v99_v10 = vpop.permute.xlu1 %98  ;;  %v89_v11 = vpop.permute.xlu0 %88 }
  0x8b   :  { %102 = vst.msk [vmem:[#allocation2 + $0x1c] sm:$0xf] %vm101_vm6, %v99_v10 }
  0x8c   :  { %92 = vst.msk [vmem:[#allocation2 + $0x18] sm:$0xf] %vm91_vm7, %v89_v11 }
  0x8e   :  { %v79_v12 = vpop.permute.xlu1 %78  ;;  %v74_v13 = vpop.permute.xlu0 %73 }
  0x8f   :  { %v118_v14 = vld [vmem:[#allocation2 + $0x20] sm:$0xf]  ;;  %77 = vst.msk [vmem:[#allocation2 + $0x14] sm:$0xf] %vm76_vm8, %v74_v13 }
  0x90   :  { %396 = vmatpush3.msk.msra.mxu0 %vm129_vm9, %v118_v14  ;;  %82 = vst.msk [vmem:[#allocation2 + $0x14] sm:$0xf] %vm81_vm10, %v79_v12 }
  0x91   :  { %397 = vmatprep.subr.mxu0 %v492_v0 }
  0x92   :  { %v62_v15 = vpop.permute.xlu1 %61  ;;  %v52_v16 = vpop.permute.xlu0 %51 }
  0x93   :  { %v117_v17 = vld [vmem:[#allocation2 + $0x18] sm:$0xff]  ;;  %65 = vst.msk [vmem:[#allocation2 + $0xc] sm:$0xf] %vm639_vm11, %v62_v15  ;;  %vm39_vm11 = vcmask 125984  }
  0x94   :  { %55 = vst.msk [vmem:[#allocation2 + $0x8] sm:$0xf] %vm638_vm12, %v52_v16  ;;  %398 = vmatpush3.msra.mxu0 %v117_v17  ;;  %vm49_vm12 = vcmask 125976  }
  0x95   :  { %399 = vmatprep.subr.mxu0 %v492_v0 }
  0x96   :  { %v67_v18 = vpop.permute.xlu1 %66  ;;  %v57_v19 = vpop.permute.xlu0 %56 }
  0x97   :  { %70 = vst.msk [vmem:[#allocation2 + $0xc] sm:$0xf] %vm69_vm13, %v67_v18  ;;  %v116_v20 = vld [vmem:[#allocation2 + $0x10] sm:$0xff] }
  0x98   :  { %60 = vst.msk [vmem:[#allocation2 + $0x8] sm:$0xf] %vm59_vm14, %v57_v19  ;;  %400 = vmatpush3.msra.mxu0 %v116_v20 }
  0x99   :  { %239 = vst.msk [vmem:[#allocation2 + $0x10] sm:$0xf] %vm640_vm0, %v544_v2  ;;  %401 = vmatprep.subr.mxu0 %v492_v0  ;;  %vm125_vm0 = vcmask 293888  }
  0x9a   :  { %v42_v21 = vpop.permute.xlu1 %41  ;;  %v32_v22 = vpop.permute.xlu0 %31 }
  0x9b   :  { %45 = vst.msk [vmem:[#allocation2 + $0x4] sm:$0xf] %vm44_vm15, %v42_v21 }
  0x9c   :  { %35 = vst.msk [vmem:[#allocation2] sm:$0xf] %vm34_vm1, %v32_v22 }
  0x9e   :  { %v47_v23 = vpop.permute.xlu1 %46  ;;  %v37_v24 = vpop.permute.xlu0 %36 }
  0x9f   :  { %v115_v25 = vld [vmem:[#allocation2 + $0x8] sm:$0xff]  ;;  %50 = vst.msk [vmem:[#allocation2 + $0x4] sm:$0xf] %vm49_vm12, %v47_v23 }
  0xa0   :  { %40 = vst.msk [vmem:[#allocation2] sm:$0xf] %vm39_vm11, %v37_v24  ;;  %402 = vmatpush3.msra.mxu0 %v115_v25 }
  0xa1   :  { %403 = vmatprep.subr.mxu0 %v492_v0 }
  0xa2   :  { %v269_v26 = vpop.permute.xlu1 %268  ;;  %v265_v27 = vpop.permute.xlu0 %264 }
  0xa3   :  { %267 = vst.msk [vmem:[#allocation2 + $0x20] sm:$0xf] %vm106_vm3, %v265_v27  ;;  %vm642_vm3 = vcmask 11264  }
  0xa4   :  { %271 = vst.msk [vmem:[#allocation2 + $0x20] sm:$0xf] %vm111_vm5, %v269_v26 }
  0xa6   :  { %v257_v29 = vpop.permute.xlu1 %256  ;;  %v249_v30 = vpop.permute.xlu0 %248 }
  0xa7   :  { %v114_v31 = vld [vmem:[#allocation2] sm:$0xff]  ;;  %259 = vst.msk [vmem:[#allocation2 + $0x1c] sm:$0xf] %vm96_vm4, %v257_v29  ;;  %vm643_vm4 = vcmask 125952  }
  0xa8   :  { %251 = vst.msk [vmem:[#allocation2 + $0x18] sm:$0xf] %vm86_vm2, %v249_v30  ;;  %404 = vmatpush3.msra.mxu0 %v114_v31  ;;  %vm641_vm2 = vcmask 3072   ;;  %vm644_vm5 = vmmov %vm643_vm4 }
  0xa9   :  { %406 = vmatmul.mubr.msk.f32.vlgmr.msra.gmra.mxu0 %vm125_vm0, %v113_v28 }
  0xaa   :  { %v261_v32 = vpop.permute.xlu1 %260  ;;  %v253_v33 = vpop.permute.xlu0 %252 }
  0xab   :  { %263 = vst.msk [vmem:[#allocation2 + $0x1c] sm:$0xf] %vm101_vm6, %v261_v32  ;;  %v277_v34 = vld [vmem:[#allocation2 + $0x20] sm:$0xf] }
  0xac   :  { %255 = vst.msk [vmem:[#allocation2 + $0x18] sm:$0xf] %vm91_vm7, %v253_v33  ;;  %409 = vmatpush3.msk.msra.mxu1 %vm129_vm9, %v277_v34 }
  0xad   :  { %410 = vmatprep.subr.mxu1 %v492_v0 }
  0xae   :  { %v245_v35 = vpop.permute.xlu1 %244  ;;  %v241_v36 = vpop.permute.xlu0 %240 }
  0xaf   :  { %243 = vst.msk [vmem:[#allocation2 + $0x14] sm:$0xf] %vm76_vm8, %v241_v36 }
  0xb0   :  { %247 = vst.msk [vmem:[#allocation2 + $0x14] sm:$0xf] %vm81_vm10, %v245_v35 }
  0xb2   :  { %v232_v37 = vpop.permute.xlu1 %231  ;;  %v224_v38 = vpop.permute.xlu0 %223 }
  0xb3   :  { %v276_v39 = vld [vmem:[#allocation2 + $0x18] sm:$0xff]  ;;  %234 = vst.msk [vmem:[#allocation2 + $0xc] sm:$0xf] %vm641_vm2, %v232_v37 }
  0xb4   :  { %226 = vst.msk [vmem:[#allocation2 + $0x8] sm:$0xf] %vm642_vm3, %v224_v38  ;;  %411 = vmatpush3.msra.mxu1 %v276_v39 }
  0xb5   :  { %412 = vmatprep.subr.mxu1 %v492_v0 }
  0xb6   :  { %v236_v40 = vpop.permute.xlu1 %235  ;;  %v228_v41 = vpop.permute.xlu0 %227 }
  0xb7   :  { %238 = vst.msk [vmem:[#allocation2 + $0xc] sm:$0xf] %vm69_vm13, %v236_v40  ;;  %v275_v42 = vld [vmem:[#allocation2 + $0x10] sm:$0xff] }
  0xb8   :  { %230 = vst.msk [vmem:[#allocation2 + $0x8] sm:$0xf] %vm59_vm14, %v228_v41  ;;  %413 = vmatpush3.msra.mxu1 %v275_v42 }
  0xb9   :  { %414 = vmatprep.subr.mxu1 %v492_v0 }
  0xba   :  { %v216_v43 = vpop.permute.xlu1 %215  ;;  %v208_v44 = vpop.permute.xlu0 %207 }
  0xbb   :  { %218 = vst.msk [vmem:[#allocation2 + $0x4] sm:$0xf] %vm44_vm15, %v216_v43 }
  0xbc   :  { %210 = vst.msk [vmem:[#allocation2] sm:$0xf] %vm34_vm1, %v208_v44 }
  0xbe   :  { %v220_v45 = vpop.permute.xlu1 %219  ;;  %v212_v46 = vpop.permute.xlu0 %211 }
  0xbf   :  { %v274_v47 = vld [vmem:[#allocation2 + $0x8] sm:$0xff]  ;;  %222 = vst.msk [vmem:[#allocation2 + $0x4] sm:$0xf] %vm49_vm12, %v220_v45 }
  0xc0   :  { %214 = vst.msk [vmem:[#allocation2] sm:$0xf] %vm39_vm11, %v212_v46  ;;  %415 = vmatpush3.msra.mxu1 %v274_v47 }
  0xc1   :  { %416 = vmatprep.subr.mxu1 %v492_v0 }
  0xc7   :  { %v273_v49 = vld [vmem:[#allocation2] sm:$0xff] }
  0xc8   :  { %417 = vmatpush3.msra.mxu1 %v273_v49 }
  0xc9   :  { %419 = vmatmul.mubr.msk.f32.vlgmr.msra.gmra.mxu1 %vm125_vm0, %v272_v48 }
  0xcb   :  { %v123_v50 = vpop.permute.xlu0 %122  ;;  %v282_v54 = vpop.permute.xlu1 %281 }
 0x169   :  { %v199_v51 = vpop.f32.mrf.mxu0 }
 0x16a   :  { %v200_v52 = vadd.f32 %v199_v51, %v123_v50 }
 0x16b   :  { %v407_v53 = vpop.f32.mrf.mxu0 }
 0x16c   :  { %203 = vst.msk [vmem:[#allocation6] sm:$0xf] %vm643_vm4, %v200_v52 }
 0x189   :  { %v356_v55 = vpop.f32.mrf.mxu1 }
 0x18a   :  { %v357_v56 = vadd.f32 %v356_v55, %v282_v54 }
 0x18b   :  { %v420_v57 = vpop.f32.mrf.mxu1 }
 0x18c   :  { %361 = vst.msk [vmem:[#allocation6 + $0x4] sm:$0xf] %vm644_vm5, %v357_v56 }
 0x18d   :  { %476 = shalt.err (!%p473_p9)
}
 0x18e   :  { %373 = dma.vmem_to_hbm [thread:$0]  %s368_s14, 128, %s637_s3, [#allocation5], %s490_s15, %s490_s15, %s491_s16  }
 0x18f   :  { %487 = dma.done.wait [#allocation5], 128  }
 0x190   :  { %488 = vsyncadd [#allocation5], 4294967168 }
 0x191   :  { %377 = vsyncpa [#allocation4], 1 }
 0x192   :  { %378 = vsyncpa [#allocation5], 1 }

</bundles_post_ra>
